<compile_context>
chip_gen: v7x
topology: tpu7x:2x2x1
jax: 0.10.0
libtpu: 0.0.40
codegen_flags: <defaults>
</compile_context>

<pallas_src>
import math

import jax
import jax.numpy as jnp
from jax.experimental import pallas as pl
from jax.experimental.pallas import tpu as pltpu


def _round_up(v: int, m: int) -> int:
    return (v + m - 1) // m * m


def _vmem_capacity_bytes() -> int:
    """Physical VMEM of the current chip (conservative 64 MiB fallback)."""
    try:
        return int(pltpu.get_tpu_info().vmem_capacity_bytes)
    except Exception:  # pragma: no cover - unknown chip / CPU tracing
        return 64 * 1024 * 1024


def _vmem_estimate(tm, tn, dim, in_bytes, out_bytes):
    """Rough per-grid-step VMEM footprint (double-buffered IO + scratch)."""
    x_b = 2 * tm * dim * in_bytes              # x tile, double-buffered
    w13_b = 2 * dim * (2 * tn) * in_bytes      # fused w1|w3 slab
    w2_b = 2 * tn * dim * in_bytes             # w2 slab
    out_b = 2 * tm * dim * out_bytes           # output tile
    acc_b = tm * dim * 4                       # f32 accumulator scratch
    tmp_b = 3 * tm * (2 * tn) * 4              # f32 intermediates headroom
    return x_b + w13_b + w2_b + out_b + acc_b + tmp_b


def _pick_tm(tn, dim, in_bytes, out_bytes, budget):
    for tm in (1024, 768, 512, 384, 256, 192, 128, 64, 32, 16, 8):
        if _vmem_estimate(tm, tn, dim, in_bytes, out_bytes) <= budget:
            return tm
    return 8


# ---------------------------------------------------------------------------
# Kernel
# ---------------------------------------------------------------------------
def _swiglu_ffn_kernel(x_ref, w13_ref, w2_ref, o_ref, acc_ref):
    """One (row-tile, hidden-tile) step of o = (silu(x@w1) * (x@w3)) @ w2."""
    k = pl.program_id(1)
    tn = w2_ref.shape[0]

    x = x_ref[...]                                                    # (tm, dim) bf16
    # Fused w1|w3 pass: one MXU matmul producing both gate inputs.
    h13 = jnp.dot(x, w13_ref[...], preferred_element_type=jnp.float32)  # (tm, 2*tn)
    h1 = h13[:, :tn]
    h3 = h13[:, tn:]
    # SiLU gate in f32 (EUP/VPU ride in MXU slack), one downcast before w2.
    h = (h1 * jax.nn.sigmoid(h1)) * h3
    p = jnp.dot(h.astype(w2_ref.dtype), w2_ref[...],
                preferred_element_type=jnp.float32)                  # (tm, dim) f32

    @pl.when(k == 0)
    def _():
        acc_ref[...] = p            # first step writes directly (no memset)

    @pl.when(k > 0)
    def _():
        acc_ref[...] += p

    @pl.when(k == pl.num_programs(1) - 1)
    def _():
        o_ref[...] = acc_ref[...].astype(o_ref.dtype)


# ---------------------------------------------------------------------------
# One-time weight preparation (hoisted out of the per-call path)
# ---------------------------------------------------------------------------
def prepare_swiglu_weights(w1_t, w3_t, w2_t, *, tn_h=512,
                           compute_dtype=jnp.bfloat16):
    """Cast weights to compute_dtype, pad hidden to the tile multiple and fuse
    w1/w3 into a tile-interleaved (dim, 2*hidden_pad) matrix.

    w*_t are (in_features, out_features) = W^T of the nn.Linear weights.
    Returns (w13, w2, tn) to be reused across every forward call.
    """
    dim, hidden = w1_t.shape
    assert w3_t.shape == (dim, hidden)
    assert w2_t.shape == (hidden, dim)

    tn = _round_up(min(tn_h, hidden), 128)        # lane alignment
    hidden_pad = _round_up(hidden, tn)
    ph = hidden_pad - hidden

    w1c = jnp.pad(w1_t.astype(compute_dtype), ((0, 0), (0, ph)))
    w3c = jnp.pad(w3_t.astype(compute_dtype), ((0, 0), (0, ph)))
    w2c = jnp.pad(w2_t.astype(compute_dtype), ((0, ph), (0, 0)))

    # Interleave per hidden tile: [w1 tile 0 | w3 tile 0 | w1 tile 1 | ...]
    n_k = hidden_pad // tn
    w13 = jnp.concatenate(
        [w1c.reshape(dim, n_k, tn), w3c.reshape(dim, n_k, tn)], axis=2
    ).reshape(dim, 2 * hidden_pad)
    return w13, w2c, tn


# ---------------------------------------------------------------------------
# Per-call wrapper
# ---------------------------------------------------------------------------
def swiglu_mlp(x, w13, w2, tn, *, tm=None, out_dtype=None):
    """x: (..., dim). w13/w2/tn from prepare_swiglu_weights (already bf16+padded)."""
    out_dtype = x.dtype if out_dtype is None else out_dtype
    compute_dtype = w13.dtype

    dim = x.shape[-1]
    hidden_pad = w2.shape[0]
    assert w13.shape == (dim, 2 * hidden_pad)
    assert w2.shape == (hidden_pad, dim)
    assert hidden_pad % tn == 0

    lead_shape = x.shape[:-1]
    M = int(math.prod(lead_shape))

    in_bytes = jnp.dtype(compute_dtype).itemsize
    out_bytes = jnp.dtype(out_dtype).itemsize
    # Sublane packing granularity of the compute dtype (bf16 packs 16 rows).
    row_align = 16 if in_bytes == 2 else 8

    # VMEM budget: stay within the chip's physical VMEM (64 MiB on v7x,
    # 128 MiB on v5e/v6e), raise the scoped limit accordingly.
    vmem_cap = _vmem_capacity_bytes()
    vmem_limit = max(32 * 1024 * 1024, min(vmem_cap * 7 // 8, 120 * 1024 * 1024))
    budget = int(vmem_limit * 0.8)

    if tm is None:
        tm = _pick_tm(tn, dim, in_bytes, out_bytes, budget)
    tm_eff = min(tm, _round_up(M, row_align))
    tm_eff = _round_up(tm_eff, row_align)
    M_pad = _round_up(M, tm_eff)

    # Only the activations are cast/padded per call (weights already done).
    x2d = x.reshape(M, dim).astype(compute_dtype)
    if M_pad != M:
        x2d = jnp.pad(x2d, ((0, M_pad - M), (0, 0)))

    grid = (M_pad // tm_eff, hidden_pad // tn)

    out2d = pl.pallas_call(
        _swiglu_ffn_kernel,
        out_shape=jax.ShapeDtypeStruct((M_pad, dim), out_dtype),
        grid_spec=pltpu.PrefetchScalarGridSpec(
            num_scalar_prefetch=0,
            grid=grid,
            in_specs=[
                pl.BlockSpec((tm_eff, dim), lambda i, k: (i, 0)),     # x rows
                pl.BlockSpec((dim, 2 * tn), lambda i, k: (0, k)),     # fused w1|w3
                pl.BlockSpec((tn, dim), lambda i, k: (k, 0)),         # w2^T slice
            ],
            out_specs=pl.BlockSpec((tm_eff, dim), lambda i, k: (i, 0)),
            scratch_shapes=[pltpu.VMEM((tm_eff, dim), jnp.float32)],
        ),
        compiler_params=pltpu.CompilerParams(
            dimension_semantics=("parallel", "arbitrary"),
            vmem_limit_bytes=vmem_limit,
        ),
    )(x2d, w13, w2)

    if M_pad != M:
        out2d = out2d[:M]
    return out2d.reshape(*lead_shape, dim)


# ---------------------------------------------------------------------------
# Helpers mirroring the PyTorch module
# ---------------------------------------------------------------------------
def compute_hidden_dim(dim, multiple_of=256, ffn_dim_multiplier=None):
    hidden_dim = 4 * dim
    hidden_dim = int(2 * hidden_dim / 3)
    if ffn_dim_multiplier is not None:
        hidden_dim = int(ffn_dim_multiplier * hidden_dim)
    hidden_dim = multiple_of * ((hidden_dim + multiple_of - 1) // multiple_of)
    return hidden_dim


def reference_mlp(x, w1_t, w3_t, w2_t, compute_dtype=jnp.bfloat16):
    """Pure-JAX reference with the same bf16-operand / f32-accum recipe."""
    xc = x.astype(compute_dtype)
    h1 = jnp.dot(xc, w1_t.astype(compute_dtype),
                 preferred_element_type=jnp.float32)
    h3 = jnp.dot(xc, w3_t.astype(compute_dtype),
                 preferred_element_type=jnp.float32)
    h = (h1 * jax.nn.sigmoid(h1)) * h3
    out = jnp.dot(h.astype(compute_dtype), w2_t.astype(compute_dtype),
                  preferred_element_type=jnp.float32)
    return out.astype(x.dtype)


if __name__ == "__main__":
    # Small deterministic setup consistent with the module (ffn_type='swish',
    # multiple_of=256).  seq=10 exercises the row-padding path; tn_h=256
    # exercises the hidden-dimension reduction loop (2 k steps).
    batch, seq, dim = 2, 10, 128
    multiple_of = 256
    hidden = compute_hidden_dim(dim, multiple_of)   # -> 512

    key = jax.random.PRNGKey(0)
    kx, k1, k2, k3 = jax.random.split(key, 4)

    x = jax.random.normal(kx, (batch, seq, dim), dtype=jnp.float32)
    # nn.Linear(in, out).weight has shape (out, in); we store the transpose.
    w1_t = jax.random.normal(k1, (dim, hidden), dtype=jnp.float32) * (dim ** -0.5)
    w3_t = jax.random.normal(k3, (dim, hidden), dtype=jnp.float32) * (dim ** -0.5)
    w2_t = jax.random.normal(k2, (hidden, dim), dtype=jnp.float32) * (hidden ** -0.5)

    # One-time weight prep, hoisted out of the per-call path.
    w13, w2c, tn = prepare_swiglu_weights(w1_t, w3_t, w2_t, tn_h=256)
    w13, w2c = jax.block_until_ready((w13, w2c))

    out = swiglu_mlp(x, w13, w2c, tn)
    out = jax.block_until_ready(out)

    ref = reference_mlp(x, w1_t, w3_t, w2_t)
    assert out.shape == (batch, seq, dim)
    assert jnp.allclose(out, ref, atol=1e-2, rtol=1e-2), "mismatch vs reference"

    print("KERNEL_OK")
</pallas_src>

<mosaic_0001>
module attributes {stable_mosaic.version = 11 : i64} {
  func.func @_swiglu_ffn_kernel(%arg0: i32, %arg1: i32, %arg2: memref<32x128xbf16, #tpu.memory_space<vmem>>, %arg3: memref<128x512xbf16, #tpu.memory_space<vmem>>, %arg4: memref<256x128xbf16, #tpu.memory_space<vmem>>, %arg5: memref<32x128xf32, #tpu.memory_space<vmem>>, %arg6: memref<32x128xf32, #tpu.memory_space<vmem>>) attributes {dimension_semantics = [#tpu.dimension_semantics<parallel>, #tpu.dimension_semantics<arbitrary>], iteration_bounds = array<i64: 1, 2>, scalar_prefetch = 0 : i64, scratch_operands = 1 : i64, tpu.core_type = #tpu.core_type<tc>, window_params = [{transform_indices = @transform_0, window_bounds = array<i64: 32, 128>}, {transform_indices = @transform_1, window_bounds = array<i64: 128, 512>}, {transform_indices = @transform_2, window_bounds = array<i64: 256, 128>}, {transform_indices = @transform_3, window_bounds = array<i64: 32, 128>}]} {
    %c0 = arith.constant 0 : index
    %c0_0 = arith.constant 0 : index
    %0 = vector.load %arg2[%c0, %c0_0] : memref<32x128xbf16, #tpu.memory_space<vmem>>, vector<32x128xbf16>
    %c0_1 = arith.constant 0 : index
    %c0_2 = arith.constant 0 : index
    %1 = vector.load %arg3[%c0_1, %c0_2] : memref<128x512xbf16, #tpu.memory_space<vmem>>, vector<128x512xbf16>
    %cst = arith.constant dense<0.000000e+00> : vector<32x512xf32>
    %2 = tpu.matmul %0, %1, %cst {dimension_numbers = #tpu.dot_dimension_numbers<[1], [0], [0], [1], [0, 0, 1, 1], [], []>} : vector<32x128xbf16>, vector<128x512xbf16>, vector<32x512xf32> -> vector<32x512xf32>
    %3 = vector.extract_strided_slice %2 {offsets = [0, 0], sizes = [32, 256], strides = [1, 1]} : vector<32x512xf32> to vector<32x256xf32>
    %4 = vector.extract_strided_slice %2 {offsets = [0, 256], sizes = [32, 256], strides = [1, 1]} : vector<32x512xf32> to vector<32x256xf32>
    %5 = arith.negf %3 : vector<32x256xf32>
    %6 = math.exp %5 : vector<32x256xf32>
    %cst_3 = arith.constant 1.000000e+00 : f32
    %7 = vector.broadcast %cst_3 : f32 to vector<32x256xf32>
    %8 = arith.addf %7, %6 : vector<32x256xf32>
    %9 = arith.divf %7, %8 : vector<32x256xf32>
    %10 = arith.mulf %3, %9 : vector<32x256xf32>
    %11 = arith.mulf %10, %4 : vector<32x256xf32>
    %12 = arith.truncf %11 : vector<32x256xf32> to vector<32x256xbf16>
    %c0_4 = arith.constant 0 : index
    %c0_5 = arith.constant 0 : index
    %13 = vector.load %arg4[%c0_4, %c0_5] : memref<256x128xbf16, #tpu.memory_space<vmem>>, vector<256x128xbf16>
    %cst_6 = arith.constant dense<0.000000e+00> : vector<32x128xf32>
    %14 = tpu.matmul %12, %13, %cst_6 {dimension_numbers = #tpu.dot_dimension_numbers<[1], [0], [0], [1], [0, 0, 1, 1], [], []>} : vector<32x256xbf16>, vector<256x128xbf16>, vector<32x128xf32> -> vector<32x128xf32>
    %c0_i32 = arith.constant 0 : i32
    %15 = arith.cmpi eq, %arg1, %c0_i32 : i32
    %16 = arith.extui %15 : i1 to i32
    %c0_i32_7 = arith.constant 0 : i32
    %17 = arith.cmpi ne, %16, %c0_i32_7 : i32
    scf.if %17 {
      %c0_11 = arith.constant 0 : index
      %c0_12 = arith.constant 0 : index
      %24 = vector.load %arg6[%c0_11, %c0_12] : memref<32x128xf32, #tpu.memory_space<vmem>>, vector<32x128xf32>
      tpu.vector_store %arg6[%c0_11, %c0_12], %14 {strides = array<i32>} : memref<32x128xf32, #tpu.memory_space<vmem>>, vector<32x128xf32>,
    } else {
    }
    %c0_i32_8 = arith.constant 0 : i32
    %18 = arith.cmpi sgt, %arg1, %c0_i32_8 : i32
    %19 = arith.extui %18 : i1 to i32
    %c0_i32_9 = arith.constant 0 : i32
    %20 = arith.cmpi ne, %19, %c0_i32_9 : i32
    scf.if %20 {
      %c0_11 = arith.constant 0 : index
      %c0_12 = arith.constant 0 : index
      %24 = vector.load %arg6[%c0_11, %c0_12] : memref<32x128xf32, #tpu.memory_space<vmem>>, vector<32x128xf32>
      %25 = arith.addf %24, %14 : vector<32x128xf32>
      %c0_13 = arith.constant 0 : index
      %c0_14 = arith.constant 0 : index
      %26 = vector.load %arg6[%c0_13, %c0_14] : memref<32x128xf32, #tpu.memory_space<vmem>>, vector<32x128xf32>
      tpu.vector_store %arg6[%c0_13, %c0_14], %25 {strides = array<i32>} : memref<32x128xf32, #tpu.memory_space<vmem>>, vector<32x128xf32>,
    } else {
    }
    %c1_i32 = arith.constant 1 : i32
    %21 = arith.cmpi eq, %arg1, %c1_i32 : i32
    %22 = arith.extui %21 : i1 to i32
    %c0_i32_10 = arith.constant 0 : i32
    %23 = arith.cmpi ne, %22, %c0_i32_10 : i32
    scf.if %23 {
      %c0_11 = arith.constant 0 : index
      %c0_12 = arith.constant 0 : index
      %24 = vector.load %arg6[%c0_11, %c0_12] : memref<32x128xf32, #tpu.memory_space<vmem>>, vector<32x128xf32>
      %c0_13 = arith.constant 0 : index
      %c0_14 = arith.constant 0 : index
      %25 = vector.load %arg5[%c0_13, %c0_14] : memref<32x128xf32, #tpu.memory_space<vmem>>, vector<32x128xf32>
      tpu.vector_store %arg5[%c0_13, %c0_14], %24 {strides = array<i32>} : memref<32x128xf32, #tpu.memory_space<vmem>>, vector<32x128xf32>,
    } else {
    }
    return
  }
  func.func @transform_0(%arg0: i32, %arg1: i32) -> (i32, i32) {
    %c0_i32 = arith.constant 0 : i32
    %c0_i32_0 = arith.constant 0 : i32
    return %arg0, %c0_i32 : i32, i32
  }
  func.func @transform_1(%arg0: i32, %arg1: i32) -> (i32, i32) {
    %c0_i32 = arith.constant 0 : i32
    %c0_i32_0 = arith.constant 0 : i32
    return %c0_i32, %arg1 : i32, i32
  }
  func.func @transform_2(%arg0: i32, %arg1: i32) -> (i32, i32) {
    %c0_i32 = arith.constant 0 : i32
    %c0_i32_0 = arith.constant 0 : i32
    return %arg1, %c0_i32 : i32, i32
  }
  func.func @transform_3(%arg0: i32, %arg1: i32) -> (i32, i32) {
    %c0_i32 = arith.constant 0 : i32
    %c0_i32_0 = arith.constant 0 : i32
    return %arg0, %c0_i32 : i32, i32
  }
}

</mosaic_0001>

<bundles_post_ra>
// kernel: tpu_custom_call.1
= control target key start
LH: loop header
LB: loop body
LE: loop exit
PB: predicated region body
PF: predicated region fallthrough
CT: control target
= control target key end

     0   :  { %8 = vsyncpa [#allocation4], 0  ;;  %s1768_s0 = inlined_call_operand.hbm [shape: bf16[32,128], index: 0, kind: input, shape index: {}]   ;;  %s1769_s1 = inlined_call_operand.hbm [shape: bf16[128,1024], index: 1, kind: input, shape index: {}]   ;;  %s1770_s2 = inlined_call_operand.hbm [shape: bf16[512,128], index: 2, kind: input, shape index: {}]   ;;  %s1771_s3 = inlined_call_operand.hbm [shape: f32[32,128], index: 3, kind: output, shape index: {}]  }
   0x1   :  { %9 = vsyncpa [#allocation7], 0 }
   0x2   :  { %11 = vsyncpa [#allocation7 + $0x1], 0 }
   0x3   :  { %12 = vsyncpa [#allocation5], 0  ;;  %s1476_s12 = smov 0   ;;  %s1478_s13 = smov 0  }
   0x4   :  { %s1480_s14 = smov 0   ;;  %s1482_s15 = smov 0  }
   0x5   :  { %s1484_s16 = smov 0   ;;  %s1486_s17 = smov 0  }
   0x6 LB: > { %s27_s18 = sadd.s32 1, %s1438_s16  ;;  %s63_s19 = sadd.s32 1, %s1430_s14  ;;  %s1442_s17 = sphi %s1486_s17, %s18_s17   ;;  %s1438_s16 = sphi %s1484_s16, %s1793_s16   ;;  %s1434_s15 = sphi %s1482_s15, %s1792_s15   ;;  %s1430_s14 = sphi %s1480_s14, %s1791_s14   ;;  %s1426_s13 = sphi %s1478_s13, %s1790_s13   ;;  %s1422_s12 = sphi %s1476_s12, %s1789_s12  }
   0x7   : > { %p28_p0 = scmp.ge.s32.totalorder %s27_s18, 2  ;;  %p70_p1 = scmp.ne.s32.totalorder %s1430_s14, %s1426_s13 }
   0x8   : > { %p71_p2 = scmp.eq.s32.totalorder %s1442_s17, 0  ;;  %p1110_p4 = scmp.lt.s32.totalorder %s1442_s17, 2 }
   0x9   : > { %s1795_s18 = smov (%p28_p0, %s27_s18), 0  ;;  %s168_s21 = sand.u32 1, %s1442_s17  }
   0xa   : > { %p72_p3 = por %p71_p2, %p70_p1  ;;  %s60_s20 = ssub.s32 %s1438_s16, %s1795_s18 }
   0xb   : > { %p61_p5 = scmp.eq.s32.totalorder %s60_s20, 0  ;;  %s170_s22 = sand.u32 1, %s1430_s14  }
   0xc   : > { %s1040_s23 = sshll.u32 %s1438_s16, 8  ;;  %s965_s25 = sshll.u32 %s170_s22, 8 }
   0xd   : > { %s1520_s24 = scalar_select %p61_p5, %s1430_s14, %s63_s19  }
   0xe   : > { %s1527_s28 = scalar_lea.hbm %s1769_s1, %s1040_s23  ;;  %p1529_p6 = pnand %p1110_p4, %p72_p3 }
   0xf   : > { %s172_s30 = scalar_lea.vmem [#allocation6], %s965_s25  ;;  %s1535_s5 = scalar_lea.sflag [#allocation7], %s168_s21 }
  0x10   : > { %s1778_s29 = scalar_select %p1529_p6, 1, 0 }
  0x11   : > { %s179_s4 = sshll.u32 %s172_s30, 4  ;;  %s1270_s6 = scalar_lea.hbm %s1527_s28, 4096  ;;  %s1533_s4 = int_to_ptr.vmem [resolvable:$true] %s179_s4 }
  0x12   : > { %p1271_p7 = scmp.ne.s32.totalorder %s1527_s28, %s1270_s6  ;;  %p1773_p8 = pneg %p1529_p6 }
  0x13   : > { %s1275_s9 = scalar_lea.hbm %s1769_s1, 8192  ;;  %p1276_p11 = scmp.lt.u32.totalorder %s1527_s28, %s1769_s1 }
  0x14   : > { %p1273_p9 = pnand %p1773_p8, %p1271_p7  ;;  %p1277_p12 = scmp.lt.u32.totalorder %s1275_s9, %s1270_s6 }
  0x15   : > { %p1279_p0 = scmp.lt.u32.totalorder %s1270_s6, %s1527_s28 }
  0x16   : > { %p1274_p10 = pneg %p1273_p9  ;;  %p1278_p13 = por %p1277_p12, %p1276_p11 }
  0x18   : > { %p1280_p1 = por %p1279_p0, %p1278_p13 }
  0x1a   : > { %p1281_p2 = pnand %p1280_p1, %p1274_p10 }
  0x1c   : > { %1284 = shalt.err (!%p1281_p2)
}
  0x1d   : > { %s1285_s19 = scalar_lea.vmem %s1533_s4, 4096  ;;  %s1444_s20 = smov [#allocation6]  }
  0x1e   : > { %p1286_p3 = scmp.ne.s32.totalorder %s1533_s4, %s1285_s19  ;;  %s1290_s21 = sshll.u32 %s1444_s20, 4  ;;  %s1291_s21 = int_to_ptr.vmem [resolvable:$false] %s1290_s21 }
  0x1f   : > { %s1292_s23 = scalar_lea.vmem %s1291_s21, 8192  ;;  %p1293_p7 = scmp.lt.s32.totalorder %s1533_s4, %s1291_s21 }
  0x20   : > { %p1288_p4 = pnand %p1286_p3, %p1773_p8  ;;  %p1294_p9 = scmp.lt.s32.totalorder %s1292_s23, %s1285_s19 }
  0x22   : > { %p1289_p5 = pneg %p1288_p4  ;;  %p1295_p11 = por %p1294_p9, %p1293_p7 }
  0x24   : > { %p1296_p12 = pnand %p1295_p11, %p1289_p5 }
  0x26   : > { %1299 = shalt.err (!%p1296_p12)
}
  0x27   : > { %s1445_s25 = smov 512   ;;  %s1446_s26 = smov 256  }
  0x28   : > { %s1447_s27 = smov 16   ;;  %s1564_s30 = sadd.s32 4294967295, %s1442_s17  }
  0x29   : > { %1105 = dma.hbm_to_vmem [thread:$0]  (!%p1529_p6), %s1527_s28, 4096, %s1533_s4, %s1535_s5, %s1445_s25, %s1446_s26, %s1447_s27  }
  0x2a   : > { %p76_p10 = scmp.ne.s32.totalorder %s1426_s13, %s1422_s12  ;;  %p1772_p13 = scmp.eq.s32.totalorder %s1564_s30, 0 }
  0x2b   : > { %p962_p0 = scmp.ge.s32.totalorder %s1442_s17, 1  ;;  %p139_p1 = scmp.lt.s32.totalorder %s1442_s17, 3 }
  0x2c   : > { %p1573_p2 = por %p1772_p13, %p76_p10  ;;  %s1448_s28 = smov [#allocation3]  }
  0x2d   : > { %p1577_p3 = pnand %p962_p0, %p139_p1  ;;  %s154_s4 = sshll.u32 %s1448_s28, 4  ;;  %s1581_s4 = int_to_ptr.vmem [resolvable:$true] %s154_s4 }
  0x2e   : > { %s1779_s6 = scalar_select %p1573_p2, 1, 0 }
  0x2f   : > { %s1780_s7 = scalar_select %p1577_p3, 1, 0 }
  0x30   : > { %p1098_p4 = pneg %p1577_p3  ;;  %s968_s12 = sshll.u32 %s170_s22, 7 }
  0x31   : > { %s1041_s8 = sshll.u32 %s1438_s16, 11  ;;  %s193_s20 = scalar_lea.vmem [#allocation8], %s968_s12 }
  0x32   : > { %p1590_p5 = pnand %p1098_p4, %p1772_p13  ;;  %s1597_s19 = scalar_lea.hbm %s1770_s2, %s1041_s8 }
  0x33   : > { %s200_s21 = sshll.u32 %s193_s20, 4  ;;  %s1300_s22 = scalar_lea.hbm %s1768_s0, 256  ;;  %s1599_s21 = int_to_ptr.vmem [resolvable:$true] %s200_s21 }
  0x34   : > { %p1301_p7 = scmp.ne.s32.totalorder %s1768_s0, %s1300_s22  ;;  %p1302_p9 = pneg %p1590_p5 }
  0x35   : > { %p1307_p10 = scmp.lt.u32.totalorder %s1300_s22, %s1768_s0 }
  0x36   : > { %p1303_p11 = pnand %p1302_p9, %p1301_p7 }
  0x38   : > { %p1304_p12 = pneg %p1303_p11 }
  0x3a   : > { %p1309_p0 = pnand %p1307_p10, %p1304_p12 }
  0x3c   : > { %1312 = shalt.err (!%p1309_p0)
}
  0x3d   : > { %s1313_s12 = scalar_lea.vmem %s1581_s4, 256  ;;  %p1321_p8 = scmp.lt.s32.totalorder %s1581_s4, %s1581_s4 }
  0x3e   : > { %p1314_p1 = scmp.ne.s32.totalorder %s1581_s4, %s1313_s12  ;;  %p1322_p2 = scmp.lt.s32.totalorder %s1313_s12, %s1313_s12 }
  0x40   : > { %p1316_p4 = pnand %p1314_p1, %p1302_p9  ;;  %p1323_p3 = por %p1322_p2, %p1321_p8 }
  0x42   : > { %p1317_p13 = pneg %p1316_p4 }
  0x44   : > { %p1324_p6 = pnand %p1323_p3, %p1317_p13 }
  0x46   : > { %1327 = shalt.err (!%p1324_p6)
}
  0x47   : > { %s1449_s8 = smov 64   ;;  %s1450_s11 = smov 4  }
  0x48   : > { %1101 = dma.hbm_to_vmem [thread:$0]  (!%p1590_p5), %s1768_s0, 256, %s1581_s4, [#allocation4], %s1449_s8, %s1449_s8, %s1450_s11  }
  0x49   : > { %s1328_s25 = scalar_lea.hbm %s1597_s19, 2048  ;;  %p1782_p6 = scmp.ne.s32.totalorder %s1778_s29, 0 }
  0x4a   : > { %p1329_p8 = scmp.ne.s32.totalorder %s1597_s19, %s1328_s25  ;;  %s1333_s27 = scalar_lea.hbm %s1770_s2, 4096 }
  0x4b   : > { %p1783_p13 = pneg %p1782_p6  ;;  %p1334_p7 = scmp.lt.u32.totalorder %s1597_s19, %s1770_s2 }
  0x4c   : > { %p1335_p9 = scmp.lt.u32.totalorder %s1333_s27, %s1328_s25  ;;  %p1337_p12 = scmp.lt.u32.totalorder %s1328_s25, %s1597_s19 }
  0x4d   : > { %p1331_p2 = pnand %p1329_p8, %p1783_p13 }
  0x4e   : > { %p1336_p11 = por %p1335_p9, %p1334_p7 }
  0x4f   : > { %p1332_p3 = pneg %p1331_p2 }
  0x50   : > { %p1338_p10 = por %p1337_p12, %p1336_p11 }
  0x52   : > { %p1339_p0 = pnand %p1338_p10, %p1332_p3 }
  0x54   : > { %1342 = shalt.err (!%p1339_p0)
}
  0x55   : > { %s1343_s4 = scalar_lea.vmem %s1599_s21, 2048  ;;  %p1784_p1 = pmov %p1783_p13 }
  0x56   : > { %p1344_p5 = scmp.ne.s32.totalorder %s1599_s21, %s1343_s4  ;;  %s1451_s9 = smov [#allocation8]  }
  0x57   : > { %s1348_s12 = sshll.u32 %s1451_s9, 4  ;;  %s1349_s12 = int_to_ptr.vmem [resolvable:$false] %s1348_s12 }
  0x58   : > { %p1346_p4 = pnand %p1344_p5, %p1784_p1  ;;  %s1350_s20 = scalar_lea.vmem %s1349_s12, 4096 }
  0x59   : > { %p1351_p13 = scmp.lt.s32.totalorder %s1599_s21, %s1349_s12  ;;  %p1352_p2 = scmp.lt.s32.totalorder %s1350_s20, %s1343_s4 }
  0x5a   : > { %p1347_p8 = pneg %p1346_p4 }
  0x5b   : > { %p1353_p7 = por %p1352_p2, %p1351_p13 }
  0x5d   : > { %p1354_p9 = pnand %p1353_p7, %p1347_p8 }
  0x5f   : > { %1357 = shalt.err (!%p1354_p9)
}
  0x60   : > { %1108 = dma.hbm_to_vmem [thread:$0]  (!%p1782_p6), %s1597_s19, 2048, %s1599_s21, %s1535_s5, %s1449_s8, %s1449_s8, %s1450_s11  }
  0x61   : > { %p1785_p3 = scmp.ne.s32.totalorder %s1780_s7, 0 }
  0x62   : > { %p1786_p11 = scmp.eq.s32.totalorder (!%p1785_p3), %s1564_s30, 0 }
  0x63   : > { %212 = sbr.rel (%p1785_p3) target bundleno = 665 (0x299), region = 32 }
  0x6a   : > { %1409 = dma.done.wait (%p1786_p11), [#allocation4], 256   ;;  %p1787_p12 = pmov %p1786_p11 }
  0x6b   : > { %s218_s29 = sand.u32 1, %s1564_s30   ;;  %s220_s23 = sand.u32 1, %s1426_s13  }
  0x6c   : > { %1411 = vsyncadd (%p1787_p12), [#allocation4], 4294967040  ;;  %s973_s25 = sshll.u32 %s220_s23, 8  ;;  %s219_s22 = scalar_lea.sflag [#allocation7], %s218_s29 }
  0x6d   : > { %s1662_s26 = scalar_lea.vmem [#allocation6], %s973_s25  ;;  %p1788_p6 = scmp.ne.s32.totalorder %s1779_s6, 0 }
  0x6f   : > { %1413 = dma.done.wait (%p1788_p6), %s219_s22, 6144  }
  0x70   : > { %1415 = vsyncadd (%p1788_p6), %s219_s22, 4294961152  ;;  %v1452_v0 = vmov 0   ;;  %v1172_v1 = vld [vmem:[%s1662_s26 + $0x4] ss:$16 sps:$4 sm:$0xff]   ;;  %v1174_v2 = vld [vmem:[%s1662_s26] ss:$16 sps:$4 sm:$0xff]  }
  0x71   : > { %499 = vmatprep.mubr.bf16.mxu0 %v1452_v0  ;;  %552 = vmatprep.mubr.bf16.mxu1 %v1452_v0  ;;  %v1175_v3 = vld [vmem:[%s1662_s26 + $0x24] ss:$16 sps:$4 sm:$0xff]   ;;  %v1177_v4 = vld [vmem:[%s1662_s26 + $0x20] ss:$16 sps:$4 sm:$0xff]   ;;  %v1193_v8 = vld [vmem:[%s1662_s26 + $0xc] ss:$16 sps:$4 sm:$0xff]  }
  0x72   : > { %467 = vmatprep.subr.bf16.mxu0 %v1172_v1  ;;  %v1178_v5 = vld [vmem:[%s1662_s26 + $0x44] ss:$16 sps:$4 sm:$0xff]   ;;  %v1180_v6 = vld [vmem:[%s1662_s26 + $0x40] ss:$16 sps:$4 sm:$0xff]   ;;  %v1195_v9 = vld [vmem:[%s1662_s26 + $0x8] ss:$16 sps:$4 sm:$0xff]   ;;  %520 = vmatprep.subr.bf16.mxu1 %v1193_v8 }
  0x73   : > { %468 = vmatpush1.bf16.msra.mxu0 %v1174_v2  ;;  %v1181_v7 = vld [vmem:[%s1662_s26 + $0x64] ss:$16 sps:$4 sm:$0xff]   ;;  %v1183_v10 = vld [vmem:[%s1662_s26 + $0x60] ss:$16 sps:$4 sm:$0xff]   ;;  %v1199_v12 = vld [vmem:[%s1662_s26 + $0x2c] ss:$16 sps:$4 sm:$0xff]   ;;  %521 = vmatpush1.bf16.msra.mxu1 %v1195_v9 }
  0x74   : > { %469 = vmatprep.subr.bf16.mxu0 %v1175_v3  ;;  %v1184_v11 = vld [vmem:[%s1662_s26 + $0x84] ss:$16 sps:$4 sm:$0xff]   ;;  %v1201_v13 = vld [vmem:[%s1662_s26 + $0x28] ss:$16 sps:$4 sm:$0xff]   ;;  %522 = vmatprep.subr.bf16.mxu1 %v1199_v12  ;;  %v1186_v14 = vld [vmem:[%s1662_s26 + $0x80] ss:$16 sps:$4 sm:$0xff]  }
  0x75   : > { %v1203_v15 = vld [vmem:[%s1662_s26 + $0x4c] ss:$16 sps:$4 sm:$0xff]   ;;  %v1187_v16 = vld [vmem:[%s1662_s26 + $0xa4] ss:$16 sps:$4 sm:$0xff]   ;;  %v1205_v17 = vld [vmem:[%s1662_s26 + $0x48] ss:$16 sps:$4 sm:$0xff]  }
  0x76   : > { %v1206_v18 = vld [vmem:[%s1662_s26 + $0x6c] ss:$16 sps:$4 sm:$0xff]   ;;  %v1189_v19 = vld [vmem:[%s1662_s26 + $0xa0] ss:$16 sps:$4 sm:$0xff]   ;;  %v1190_v20 = vld [vmem:[%s1662_s26 + $0xc4] ss:$16 sps:$4 sm:$0xff]  }
  0x77   : > { %470 = vmatpush1.bf16.msra.mxu0 %v1177_v4  ;;  %523 = vmatpush1.bf16.msra.mxu1 %v1201_v13  ;;  %v1208_v21 = vld [vmem:[%s1662_s26 + $0x68] ss:$16 sps:$4 sm:$0xff]   ;;  %v1210_v22 = vld [vmem:[%s1662_s26 + $0x8c] ss:$16 sps:$4 sm:$0xff]   ;;  %v1192_v23 = vld [vmem:[%s1662_s26 + $0xc0] ss:$16 sps:$4 sm:$0xff]  }
  0x78   : > { %471 = vmatprep.subr.bf16.mxu0 %v1178_v5  ;;  %524 = vmatprep.subr.bf16.mxu1 %v1203_v15  ;;  %v1196_v24 = vld [vmem:[%s1662_s26 + $0xe4] ss:$16 sps:$4 sm:$0xff]   ;;  %v1212_v25 = vld [vmem:[%s1662_s26 + $0x88] ss:$16 sps:$4 sm:$0xff]   ;;  %v1213_v26 = vld [vmem:[%s1662_s26 + $0xac] ss:$16 sps:$4 sm:$0xff]  }
  0x79   : > { %v1198_v27 = vld [vmem:[%s1662_s26 + $0xe0] ss:$16 sps:$4 sm:$0xff]   ;;  %v1215_v28 = vld [vmem:[%s1662_s26 + $0xa8] ss:$16 sps:$4 sm:$0xff]   ;;  %v1216_v30 = vld [vmem:[%s1662_s26 + $0xcc] ss:$16 sps:$4 sm:$0xff]  }
  0x7a   : > { %v1202_v29 = vld [vmem:[#allocation3] sm:$0xff]   ;;  %v1218_v31 = vld [vmem:[%s1662_s26 + $0xc8] ss:$16 sps:$4 sm:$0xff]   ;;  %v1219_v32 = vld [vmem:[%s1662_s26 + $0xec] ss:$16 sps:$4 sm:$0xff]   ;;  %s974_s5 = sshll.u32 %s220_s23, 7 }
  0x7b   : > { %472 = vmatpush1.bf16.msra.mxu0 %v1180_v6  ;;  %525 = vmatpush1.bf16.msra.mxu1 %v1205_v17  ;;  %v1221_v33 = vld [vmem:[%s1662_s26 + $0xe8] ss:$16 sps:$4 sm:$0xff]   ;;  %s1706_s6 = scalar_lea.vmem [#allocation8], %s974_s5  ;;  %p1033_p10 = scmp.ne.s32.totalorder %s1434_s15, 0 }
  0x7c   : > { %473 = vmatprep.subr.bf16.mxu0 %v1181_v7  ;;  %526 = vmatprep.subr.bf16.mxu1 %v1206_v18  ;;  %v1209_v34 = vld [vmem:[#allocation3 + $0x8] sm:$0xff]   ;;  %v1222_v35 = vld [vmem:[%s1706_s6 + $0x40] sm:$0xff]   ;;  %v1224_v37 = vld [vmem:[%s1706_s6 + $0x48] sm:$0xff]  }
  0x7d   : > { %v1223_v36 = vld [vmem:[%s1706_s6] sm:$0xff]   ;;  %v1225_v38 = vld [vmem:[%s1706_s6 + $0x8] sm:$0xff]   ;;  %v1226_v39 = vld [vmem:[%s1706_s6 + $0x50] sm:$0xff]  }
  0x7e   : > { %v1227_v40 = vld [vmem:[%s1706_s6 + $0x10] sm:$0xff]   ;;  %v1228_v41 = vld [vmem:[%s1706_s6 + $0x58] sm:$0xff]   ;;  %v1230_v43 = vld [vmem:[%s1706_s6 + $0x60] sm:$0xff]  }
  0x7f   : > { %474 = vmatpush1.bf16.msra.mxu0 %v1183_v10  ;;  %527 = vmatpush1.bf16.msra.mxu1 %v1208_v21  ;;  %v1229_v42 = vld [vmem:[%s1706_s6 + $0x18] sm:$0xff]   ;;  %v1231_v44 = vld [vmem:[%s1706_s6 + $0x20] sm:$0xff]   ;;  %v1232_v45 = vld [vmem:[%s1706_s6 + $0x68] sm:$0xff]  }
  0x80   : > { %475 = vmatprep.subr.bf16.mxu0 %v1184_v11  ;;  %528 = vmatprep.subr.bf16.mxu1 %v1210_v22  ;;  %v1233_v46 = vld [vmem:[%s1706_s6 + $0x28] sm:$0xff]   ;;  %v1234_v47 = vld [vmem:[%s1706_s6 + $0x70] sm:$0xff]   ;;  %v1236_v49 = vld [vmem:[%s1706_s6 + $0x78] sm:$0xff]  }
  0x81   : > { %v1235_v48 = vld [vmem:[%s1706_s6 + $0x30] sm:$0xff]   ;;  %v1237_v50 = vld [vmem:[%s1706_s6 + $0x38] sm:$0xff]  }
  0x83   : > { %476 = vmatpush1.bf16.msra.mxu0 %v1186_v14  ;;  %529 = vmatpush1.bf16.msra.mxu1 %v1212_v25 }
  0x84   : > { %477 = vmatprep.subr.bf16.mxu0 %v1187_v16  ;;  %530 = vmatprep.subr.bf16.mxu1 %v1213_v26 }
  0x87   : > { %478 = vmatpush1.bf16.msra.mxu0 %v1189_v19  ;;  %531 = vmatpush1.bf16.msra.mxu1 %v1215_v28 }
  0x88   : > { %479 = vmatprep.subr.bf16.mxu0 %v1190_v20  ;;  %532 = vmatprep.subr.bf16.mxu1 %v1216_v30 }
  0x8b   : > { %480 = vmatpush1.bf16.msra.mxu0 %v1192_v23  ;;  %533 = vmatpush1.bf16.msra.mxu1 %v1218_v31 }
  0x8c   : > { %481 = vmatprep.subr.bf16.mxu0 %v1196_v24  ;;  %534 = vmatprep.subr.bf16.mxu1 %v1219_v32 }
  0x8f   : > { %482 = vmatpush1.bf16.msra.mxu0 %v1198_v27  ;;  %535 = vmatpush1.bf16.msra.mxu1 %v1221_v33 }
  0x90   : > { %1042 = vmatprep.subr.bf16.mxu0 %v1222_v35  ;;  %1070 = vmatprep.subr.bf16.mxu1 %v1222_v35 }
  0x92   : > { %500 = vmatmul.mubr.bf16.vlgmr.msra.gmra.mrb[0].mxu0 %v1202_v29  ;;  %553 = vmatmul.mubr.bf16.vlgmr.msra.gmra.mrb[0].mxu1 %v1202_v29 }
  0x93   : > { %509 = vmatprep.mubr.bf16.mxu0 %v1452_v0  ;;  %562 = vmatprep.mubr.bf16.mxu1 %v1452_v0 }
  0x94   : > { %1043 = vmatpush3.bf16.msra.mxu0 %v1223_v36  ;;  %1078 = vmatpush3.bf16.msra.mxu1 %v1223_v36 }
  0x95   : > { %1044 = vmatprep.subr.bf16.mxu0 %v1224_v37  ;;  %1071 = vmatprep.subr.bf16.mxu1 %v1224_v37 }
  0x98   : > { %1045 = vmatpush3.bf16.msra.mxu0 %v1225_v38  ;;  %1079 = vmatpush3.bf16.msra.mxu1 %v1225_v38 }
  0x99   : > { %1046 = vmatprep.subr.bf16.mxu0 %v1226_v39  ;;  %1072 = vmatprep.subr.bf16.mxu1 %v1226_v39 }
  0x9a   : > { %510 = vmatmul.mubr.bf16.gmra.mrb[4].mxu0 %v1209_v34  ;;  %563 = vmatmul.mubr.bf16.gmra.mrb[4].mxu1 %v1209_v34 }
  0x9c   : > { %1047 = vmatpush3.bf16.msra.mxu0 %v1227_v40  ;;  %1080 = vmatpush3.bf16.msra.mxu1 %v1227_v40 }
  0x9d   : > { %1048 = vmatprep.subr.bf16.mxu0 %v1228_v41  ;;  %1073 = vmatprep.subr.bf16.mxu1 %v1228_v41 }
  0xa0   : > { %1049 = vmatpush3.bf16.msra.mxu0 %v1229_v42  ;;  %1081 = vmatpush3.bf16.msra.mxu1 %v1229_v42 }
  0xa1   : > { %1050 = vmatprep.subr.bf16.mxu0 %v1230_v43  ;;  %1074 = vmatprep.subr.bf16.mxu1 %v1230_v43 }
  0xa4   : > { %1051 = vmatpush3.bf16.msra.mxu0 %v1231_v44  ;;  %1082 = vmatpush3.bf16.msra.mxu1 %v1231_v44 }
  0xa5   : > { %1052 = vmatprep.subr.bf16.mxu0 %v1232_v45  ;;  %1075 = vmatprep.subr.bf16.mxu1 %v1232_v45 }
  0xa8   : > { %1053 = vmatpush3.bf16.msra.mxu0 %v1233_v46  ;;  %1083 = vmatpush3.bf16.msra.mxu1 %v1233_v46 }
  0xa9   : > { %1054 = vmatprep.subr.bf16.mxu0 %v1234_v47  ;;  %1076 = vmatprep.subr.bf16.mxu1 %v1234_v47 }
  0xac   : > { %1055 = vmatpush3.bf16.msra.mxu0 %v1235_v48  ;;  %1084 = vmatpush3.bf16.msra.mxu1 %v1235_v48 }
  0xad   : > { %1056 = vmatprep.subr.bf16.mxu0 %v1236_v49  ;;  %1077 = vmatprep.subr.bf16.mxu1 %v1236_v49 }
  0xb0   : > { %1057 = vmatpush3.bf16.msra.mxu0 %v1237_v50  ;;  %1085 = vmatpush3.bf16.msra.mxu1 %v1237_v50 }
 0x165   : > { %v501_v51 = vpop.f32.mrb[0].mxu0  ;;  %v554_v0 = vpop.f32.mrb[0].mxu1 }
 0x166   : > { %v1009_v52 = vmul.f32 -1.442695, %v501_v51  ;;  %v503_v53 = vpop.f32.mrb[1].mxu0  ;;  %v556_v3 = vpop.f32.mrb[1].mxu1 }
 0x167   : > { %v1010_v54 = vmul.f32 -1.442695, %v503_v53  ;;  %v505_v55 = vpop.f32.mrb[2].mxu0  ;;  %v558_v5 = vpop.f32.mrb[2].mxu1 }
 0x168   : > { %1238 = vpow2.f32 %v1009_v52  ;;  %v1011_v56 = vmul.f32 -1.442695, %v505_v55  ;;  %v507_v57 = vpop.f32.mrb[3].mxu0  ;;  %v560_v7 = vpop.f32.mrb[3].mxu1 }
 0x169   : > { %1240 = vpow2.f32 %v1010_v54  ;;  %v1012_v58 = vmul.f32 -1.442695, %v507_v57 }
 0x16a   : > { %1242 = vpow2.f32 %v1011_v56 }
 0x16b   : > { %1244 = vpow2.f32 %v1012_v58 }
 0x16d   : > { %v511_v59 = vpop.f32.mrb[4].mxu0  ;;  %v564_v15 = vpop.f32.mrb[4].mxu1 }
 0x16e   : > { %v1013_v60 = vmul.f32 -1.442695, %v511_v59  ;;  %v513_v61 = vpop.f32.mrb[5].mxu0  ;;  %v566_v16 = vpop.f32.mrb[5].mxu1 }
 0x16f   : > { %v1014_v62 = vmul.f32 -1.442695, %v513_v61  ;;  %v515_v63 = vpop.f32.mrb[6].mxu0  ;;  %v568_v17 = vpop.f32.mrb[6].mxu1 }
 0x170   : > { %1246 = vpow2.f32 %v1013_v60  ;;  %v1015_v1 = vmul.f32 -1.442695, %v515_v63  ;;  %v517_v2 = vpop.f32.mrb[7].mxu0  ;;  %v570_v19 = vpop.f32.mrb[7].mxu1 }
 0x171   : > { %1248 = vpow2.f32 %v1014_v62  ;;  %v1016_v4 = vmul.f32 -1.442695, %v517_v2 }
 0x172   : > { %v1239_v6 = vpop.eup %1238  ;;  %1250 = vpow2.f32 %v1015_v1 }
 0x173   : > { %v1241_v8 = vpop.eup %1240  ;;  %v597_v9 = vadd.f32 1.0, %v1239_v6  ;;  %1252 = vpow2.f32 %v1016_v4 }
 0x174   : > { %v1243_v10 = vpop.eup %1242  ;;  %v598_v11 = vadd.f32 1.0, %v1241_v8 }
 0x175   : > { %v1245_v12 = vpop.eup %1244  ;;  %1254 = vrcp.f32 %v597_v9  ;;  %v599_v13 = vadd.f32 1.0, %v1243_v10 }
 0x176   : > { %1256 = vrcp.f32 %v598_v11  ;;  %v600_v14 = vadd.f32 1.0, %v1245_v12 }
 0x177   : > { %1258 = vrcp.f32 %v599_v13 }
 0x178   : > { %1260 = vrcp.f32 %v600_v14 }
 0x17a   : > { %v1247_v18 = vpop.eup %1246 }
 0x17b   : > { %v1249_v20 = vpop.eup %1248  ;;  %v601_v21 = vadd.f32 1.0, %v1247_v18 }
 0x17c   : > { %v1251_v22 = vpop.eup %1250  ;;  %v602_v23 = vadd.f32 1.0, %v1249_v20 }
 0x17d   : > { %v1253_v24 = vpop.eup %1252  ;;  %1262 = vrcp.f32 %v601_v21  ;;  %v603_v25 = vadd.f32 1.0, %v1251_v22 }
 0x17e   : > { %1264 = vrcp.f32 %v602_v23  ;;  %v604_v26 = vadd.f32 1.0, %v1253_v24 }
 0x17f   : > { %v1255_v27 = vpop.eup %1254  ;;  %1266 = vrcp.f32 %v603_v25 }
 0x180   : > { %v1257_v28 = vpop.eup %1256  ;;  %v621_v29 = vmul.f32 %v1255_v27, %v501_v51  ;;  %1268 = vrcp.f32 %v604_v26 }
 0x181   : > { %v1259_v30 = vpop.eup %1258  ;;  %v622_v31 = vmul.f32 %v1257_v28, %v503_v53 }
 0x182   : > { %v1261_v32 = vpop.eup %1260  ;;  %v623_v33 = vmul.f32 %v1259_v30, %v505_v55  ;;  %v629_v34 = vmul.f32 %v621_v29, %v554_v0 }
 0x183   : > { %v624_v35 = vmul.f32 %v1261_v32, %v507_v57  ;;  %v630_v36 = vmul.f32 %v622_v31, %v556_v3 }
 0x184   : > { %v631_v37 = vmul.f32 %v623_v33, %v558_v5 }
 0x185   : > { %v632_v38 = vmul.f32 %v624_v35, %v560_v7 }
 0x186   : > { %v637_v39 = vpack.c.bf16 %v631_v37, %v629_v34 }
 0x187   : > { %v1263_v40 = vpop.eup %1262  ;;  %v638_v41 = vpack.c.bf16 %v632_v38, %v630_v36 }
 0x188   : > { %v1265_v42 = vpop.eup %1264  ;;  %v625_v43 = vmul.f32 %v1263_v40, %v511_v59 }
 0x189   : > { %v1267_v44 = vpop.eup %1266  ;;  %v626_v45 = vmul.f32 %v1265_v42, %v513_v61  ;;  %801 = vmatprep.mubr.bf16.mxu0 %v638_v41 }
 0x18a   : > { %v1269_v46 = vpop.eup %1268  ;;  %v627_v47 = vmul.f32 %v1267_v44, %v515_v63  ;;  %v633_v48 = vmul.f32 %v625_v43, %v564_v15  ;;  %802 = vmatmul.mubr.bf16.vlgmr.msra.gmra.mrb[8].mxu0 %v637_v39 }
 0x18b   : > { %v628_v49 = vmul.f32 %v1269_v46, %v517_v2  ;;  %v634_v50 = vmul.f32 %v626_v45, %v566_v16 }
 0x18c   : > { %v635_v51 = vmul.f32 %v627_v47, %v568_v17 }
 0x18d   : > { %v636_v52 = vmul.f32 %v628_v49, %v570_v19 }
 0x18e   : > { %v639_v53 = vpack.c.bf16 %v635_v51, %v633_v48 }
 0x18f   : > { %v640_v54 = vpack.c.bf16 %v636_v52, %v634_v50 }
 0x191   : > { %809 = vmatprep.mubr.bf16.mxu1 %v640_v54 }
 0x192   : > { %810 = vmatmul.mubr.bf16.vlgmr.msra.gmra.mrb[8].mxu1 %v639_v53 }
 0x25d   : > { %v1058_v55 = vpop.f32.mrb[8].mxu0 }
 0x25e   : > { %v1059_v56 = vpop.f32.mrb[9].mxu0 }
 0x25f   : > { %v1060_v57 = vadd.f32 %v1059_v56, %v1058_v55  ;;  %v1061_v58 = vpop.f32.mrb[10].mxu0 }
 0x260   : > { %v1062_v59 = vpop.f32.mrb[11].mxu0 }
 0x261   : > { %v1063_v60 = vadd.f32 %v1062_v59, %v1061_v58  ;;  %822 = vst [vmem:[#allocation2] sm:$0xff] (!%p1033_p10), %v1060_v57 }
 0x263   : > { %821 = sbr.rel (%p1033_p10) target bundleno = 620 (0x26c), region = 48  ;;  %823 = vst [vmem:[#allocation2 + $0x8] sm:$0xff] (!%p1033_p10), %v1063_v60 }
 0x265   : > { %v1064_v61 = vpop.f32.mrb[8].mxu1 }
 0x266   : > { %v1065_v62 = vpop.f32.mrb[9].mxu1 }
 0x267   : > { %v1066_v0 = vadd.f32 %v1065_v62, %v1064_v61  ;;  %v1067_v63 = vpop.f32.mrb[10].mxu1 }
 0x268   : > { %v1068_v1 = vpop.f32.mrb[11].mxu1 }
 0x269   : > { %v1069_v3 = vadd.f32 %v1068_v1, %v1067_v63  ;;  %824 = vst [vmem:[#allocation2 + $0x10] sm:$0xff] (!%p1033_p10), %v1066_v0 }
 0x26b   : > { %825 = vst [vmem:[#allocation2 + $0x18] sm:$0xff] %v1069_v3 }
 0x26c PF: > { %p1034_p0 = scmp.le.s32.totalorder %s1434_s15, 0 }
 0x26d   : > { %v830_v2 = vld [vmem:[#allocation2] sm:$0xff] (!%p1034_p0)  ;;  %v831_v4 = vld [vmem:[#allocation2 + $0x8] sm:$0xff] (!%p1034_p0) }
 0x26e   : > { %829 = sbr.rel (%p1034_p0) target bundleno = 630 (0x276), region = 52  ;;  %v834_v6 = vadd.f32 (!%p1034_p0), %v1060_v57, %v830_v2  ;;  %v835_v7 = vadd.f32 (!%p1034_p0), %v1063_v60, %v831_v4 }
 0x270   : > { %838 = vst [vmem:[#allocation2] sm:$0xff] (!%p1034_p0), %v834_v6  ;;  %839 = vst [vmem:[#allocation2 + $0x8] sm:$0xff] (!%p1034_p0), %v835_v7 }
 0x272   : > { %v832_v5 = vld [vmem:[#allocation2 + $0x10] sm:$0xff] (!%p1034_p0)  ;;  %v833_v9 = vld [vmem:[#allocation2 + $0x18] sm:$0xff] (!%p1034_p0) }
 0x273   : > { %v836_v8 = vadd.f32 (!%p1034_p0), %v1066_v0, %v832_v5  ;;  %v837_v10 = vadd.f32 (!%p1034_p0), %v1069_v3, %v833_v9 }
 0x275   : > { %840 = vst [vmem:[#allocation2 + $0x10] sm:$0xff] %v836_v8  ;;  %841 = vst [vmem:[#allocation2 + $0x18] sm:$0xff] %v837_v10 }
 0x276 PF: > { %p1035_p5 = scmp.ne.s32.totalorder %s1434_s15, 1 }
 0x278   : > { %845 = sbr.rel (%p1035_p5) target bundleno = 639 (0x27f), region = 56  ;;  %v846_v11 = vld [vmem:[#allocation2] sm:$0xff] (!%p1035_p5)  ;;  %v847_v12 = vld [vmem:[#allocation2 + $0x8] sm:$0xff] (!%p1035_p5) }
 0x279   : > { %850 = vst [vmem:[#allocation9] sm:$0xff] (!%p1035_p5), %v846_v11  ;;  %851 = vst [vmem:[#allocation9 + $0x8] sm:$0xff] (!%p1035_p5), %v847_v12 }
 0x27c   : > { %v848_v13 = vld [vmem:[#allocation2 + $0x10] sm:$0xff] (!%p1035_p5)  ;;  %v849_v14 = vld [vmem:[#allocation2 + $0x18] sm:$0xff] (!%p1035_p5) }
 0x27d   : > { %852 = vst [vmem:[#allocation9 + $0x10] sm:$0xff] (!%p1035_p5), %v848_v13  ;;  %853 = vst [vmem:[#allocation9 + $0x18] sm:$0xff] (!%p1035_p5), %v849_v14 }
 0x27f PF: > { %p1112_p1 = scmp.eq.s32.totalorder %s1564_s30, 1  ;;  %s1453_s7 = smov [#allocation9]  }
 0x280   : > { %s863_s19 = sshll.u32 %s1453_s7, 4  ;;  %s864_s19 = int_to_ptr.vmem [resolvable:$true] %s863_s19 }
 0x281   : > { %s1358_s21 = scalar_lea.vmem %s864_s19, 512  ;;  %p1365_p2 = scmp.lt.s32.totalorder %s864_s19, %s864_s19 }
 0x282   : > { %p1359_p4 = scmp.ne.s32.totalorder %s864_s19, %s1358_s21  ;;  %p1366_p7 = scmp.lt.s32.totalorder %s1358_s21, %s1358_s21 }
 0x284   : > { %p1360_p8 = pnand %p1359_p4, %p1112_p1  ;;  %p1367_p9 = por %p1366_p7, %p1365_p2 }
 0x286   : > { %p1361_p13 = pneg %p1360_p8 }
 0x288   : > { %p1368_p3 = pnand %p1367_p9, %p1361_p13 }
 0x28a   : > { %1371 = shalt.err (!%p1368_p3)
}
 0x28b   : > { %s1372_s11 = scalar_lea.hbm %s1771_s3, 512 }
 0x28c   : > { %p1373_p11 = scmp.ne.s32.totalorder %s1771_s3, %s1372_s11  ;;  %p1378_p10 = scmp.lt.u32.totalorder %s1372_s11, %s1771_s3 }
 0x28e   : > { %p1374_p12 = pnand %p1373_p11, %p1112_p1 }
 0x290   : > { %p1375_p6 = pneg %p1374_p12 }
 0x292   : > { %p1380_p0 = pnand %p1378_p10, %p1375_p6 }
 0x294   : > { %1383 = shalt.err (!%p1380_p0)
}
 0x295   : > { %s1454_s9 = smov 128   ;;  %s1455_s12 = smov 8  }
 0x296   : > { %1095 = dma.vmem_to_hbm [thread:$0]  (%p1112_p1), %s864_s19, 512, %s1771_s3, [#allocation5], %s1454_s9, %s1454_s9, %s1455_s12  }
 0x297   : > { %1417 = dma.done.wait (%p1112_p1), [#allocation5], 512  }
 0x298   : > { %1419 = vsyncadd (%p1112_p1), [#allocation5], 4294966784 }
 0x299 PF: > { %s18_s17 = sadd.s32 1, %s1442_s17   ;;  %s1789_s12 = smov %s1426_s13 }
 0x29a   : > { %p15_p5 = scmp.ge.s32.totalorder %s18_s17, 4   ;;  %s1790_s13 = smov %s1430_s14 }
 0x29b   : > { %s1791_s14 = smov %s1520_s24  ;;  %s1792_s15 = smov %s1438_s16 }
 0x29c   : > { %s1793_s16 = smov %s1795_s18  ;;  %17 = sbr.rel (!%p15_p5) target bundleno = 6 (0x6), region = 99 }
 0x2a3   :  { %879 = vsyncpa [#allocation4], 1 }
 0x2a4   :  { %881 = vsyncpa [#allocation4 + $0x1], 1 }
 0x2a5   :  { %882 = vsyncpa [#allocation7], 1 }
 0x2a6   :  { %884 = vsyncpa [#allocation7 + $0x1], 1 }
 0x2a7   :  { %885 = vsyncpa [#allocation5], 1 }
 0x2a8   :  { %887 = vsyncpa [#allocation5 + $0x1], 1 }

</bundles_post_ra>
